<compile_context>
chip_gen: v7x
topology: tpu7x:2x2x1
jax: 0.10.0
libtpu: 0.0.40
codegen_flags: <defaults>
</compile_context>

<pallas_src>
import jax
import jax.numpy as jnp
from jax.experimental import pallas as pl
from jax.experimental.pallas import tpu as pltpu


_TARGET_BLOCK_BYTES = 2 * 1024 * 1024  # ~2 MiB per block (x4 live buffers = 8 MiB VMEM)


def _cubic_kernel(params_ref, x_ref, o_ref):
    # params_ref: SMEM (4,) float32 -> a, b, c, d (scalar*vector broadcasts are free on VPU)
    a = params_ref[0]
    b = params_ref[1]
    c = params_ref[2]
    d = params_ref[3]
    x = x_ref[...]
    # Horner form: ((a*x + b)*x + c)*x + d  ==  a*x^3 + b*x^2 + c*x + d
    o_ref[...] = (((a * x + b) * x + c) * x + d).astype(o_ref.dtype)


def _choose_layout(total, itemsize):
    """Pick (lanes, pad, rows, block_rows) for a lane-dense 2D slab.

    Prefers a lane width that divides `total` so the pad / output-slice HBM passes
    are skipped entirely. block_rows is ~2 MiB worth of rows, a multiple of 8
    (sublane granularity) unless it equals the full row count.
    """
    lanes = None
    for cand in (512, 256, 128):
        if total % cand == 0:
            lanes = cand
            break
    if lanes is None:
        lanes = 128
    pad = (-total) % lanes
    rows = (total + pad) // lanes

    if rows <= 8:
        # Tiny input: single block; block dim == full array dim satisfies the (8,128) rule.
        return lanes, pad, rows, rows

    # ~2 MiB blocks, multiple of 8 rows.
    target_rows = max(8, (_TARGET_BLOCK_BYTES // (lanes * itemsize)) // 8 * 8)
    block_rows = min(target_rows, rows)
    if block_rows != rows:
        block_rows = ((block_rows + 7) // 8) * 8

    # v7x megacore: make sure the "parallel" axis has >= 2 grid steps so both
    # TensorCores get work (harmless no-op on single-TC v5e/v6e).
    if pl.cdiv(rows, block_rows) < 2:
        block_rows = max(8, ((pl.cdiv(rows, 2) + 7) // 8) * 8)
    return lanes, pad, rows, block_rows


def cubic_forward(x, params):
    """Elementwise cubic polynomial via a tiled, pipelined Pallas kernel.

    x: any-shaped float array (e.g. NCHW).
    params: (4,) float32 array [a, b, c, d].
    """
    orig_shape = x.shape
    total = x.size
    itemsize = jnp.dtype(x.dtype).itemsize

    lanes, pad, rows, block_rows = _choose_layout(total, itemsize)

    x_flat = jnp.ravel(x)
    if pad:
        x_flat = jnp.pad(x_flat, (0, pad))  # rare path: pad only to a lane multiple
    x2d = x_flat.reshape(rows, lanes)

    grid = (pl.cdiv(rows, block_rows),)
    n_elems = rows * lanes

    out2d = pl.pallas_call(
        _cubic_kernel,
        out_shape=jax.ShapeDtypeStruct((rows, lanes), x.dtype),
        grid_spec=pltpu.PrefetchScalarGridSpec(
            num_scalar_prefetch=0,
            grid=grid,
            in_specs=[
                pl.BlockSpec(memory_space=pltpu.SMEM),                   # params (a,b,c,d)
                pl.BlockSpec((block_rows, lanes), lambda i: (i, 0)),     # x tile
            ],
            out_specs=pl.BlockSpec((block_rows, lanes), lambda i: (i, 0)),
        ),
        compiler_params=pltpu.CompilerParams(
            dimension_semantics=("parallel",),   # independent row-blocks -> megacore on v7x
        ),
        cost_estimate=pl.CostEstimate(
            flops=6 * n_elems,                   # 3 mul + 3 add per element (Horner)
            transcendentals=0,
            bytes_accessed=2 * n_elems * itemsize,
        ),
    )(params, x2d)

    out_flat = out2d.reshape(-1)
    if pad:
        out_flat = out_flat[:total]
    return out_flat.reshape(orig_shape)


def _ref(x, params):
    a, b, c, d = params
    return a * x ** 3 + b * x ** 2 + c * x + d


if __name__ == "__main__":
    # Deterministic parameters, matching CubicModel.__init__
    params = jnp.array([0.7, 0.3, 0.3, -0.7], dtype=jnp.float32)
    key = jax.random.PRNGKey(0)

    # 1) Small NCHW input (primary spec-consistent case): single tiny block path.
    x = jax.random.normal(key, (2, 4, 16, 16), dtype=jnp.float32)
    out = jax.block_until_ready(cubic_forward(x, params))
    assert jnp.allclose(out, _ref(x, params), atol=1e-5, rtol=1e-5), "mismatch (small case)"

    # 2) Ragged size: exercises the pad-to-lane path and the partial last row-block.
    k1, k2 = jax.random.split(key)
    x_ragged = jax.random.normal(k1, (3, 5, 7, 11), dtype=jnp.float32)
    out_r = jax.block_until_ready(cubic_forward(x_ragged, params))
    assert jnp.allclose(out_r, _ref(x_ragged, params), atol=1e-5, rtol=1e-5), "mismatch (ragged)"

    # 3) Larger divisible size: exercises the multi-block (>=2 grid steps) pipelined path.
    x_big = jax.random.normal(k2, (8, 16, 64, 64), dtype=jnp.float32)
    out_b = jax.block_until_ready(cubic_forward(x_big, params))
    assert jnp.allclose(out_b, _ref(x_big, params), atol=1e-5, rtol=1e-5), "mismatch (big)"

    print("KERNEL_OK")
</pallas_src>

<mosaic_0001>
module attributes {stable_mosaic.version = 11 : i64} {
  func.func @_cubic_kernel(%arg0: i32, %arg1: memref<4xf32, #tpu.memory_space<smem>>, %arg2: memref<4x512xf32, #tpu.memory_space<vmem>>, %arg3: memref<4x512xf32, #tpu.memory_space<vmem>>) attributes {dimension_semantics = [#tpu.dimension_semantics<parallel>], iteration_bounds = array<i64: 1>, scalar_prefetch = 0 : i64, scratch_operands = 0 : i64, tpu.core_type = #tpu.core_type<tc>, window_params = [{transform_indices = @transform_0, window_bounds = array<i64: 4>}, {transform_indices = @transform_1, window_bounds = array<i64: 4, 512>}, {transform_indices = @transform_2, window_bounds = array<i64: 4, 512>}]} {
    %c0 = arith.constant 0 : index
    %0 = memref.load %arg1[%c0] : memref<4xf32, #tpu.memory_space<smem>>
    %c1 = arith.constant 1 : index
    %1 = memref.load %arg1[%c1] : memref<4xf32, #tpu.memory_space<smem>>
    %c2 = arith.constant 2 : index
    %2 = memref.load %arg1[%c2] : memref<4xf32, #tpu.memory_space<smem>>
    %c3 = arith.constant 3 : index
    %3 = memref.load %arg1[%c3] : memref<4xf32, #tpu.memory_space<smem>>
    %c0_0 = arith.constant 0 : index
    %c0_1 = arith.constant 0 : index
    %4 = vector.load %arg2[%c0_0, %c0_1] : memref<4x512xf32, #tpu.memory_space<vmem>>, vector<4x512xf32>
    %5 = vector.broadcast %0 : f32 to vector<4x512xf32>
    %6 = arith.mulf %5, %4 : vector<4x512xf32>
    %7 = vector.broadcast %1 : f32 to vector<4x512xf32>
    %8 = arith.addf %6, %7 : vector<4x512xf32>
    %9 = arith.mulf %8, %4 : vector<4x512xf32>
    %10 = vector.broadcast %2 : f32 to vector<4x512xf32>
    %11 = arith.addf %9, %10 : vector<4x512xf32>
    %12 = arith.mulf %11, %4 : vector<4x512xf32>
    %13 = vector.broadcast %3 : f32 to vector<4x512xf32>
    %14 = arith.addf %12, %13 : vector<4x512xf32>
    %c0_2 = arith.constant 0 : index
    %c0_3 = arith.constant 0 : index
    %15 = vector.load %arg3[%c0_2, %c0_3] : memref<4x512xf32, #tpu.memory_space<vmem>>, vector<4x512xf32>
    tpu.vector_store %arg3[%c0_2, %c0_3], %14 {strides = array<i32>} : memref<4x512xf32, #tpu.memory_space<vmem>>, vector<4x512xf32>,
    return
  }
  func.func @transform_0(%arg0: i32) -> i32 {
    %c0_i32 = arith.constant 0 : i32
    %c0_i32_0 = arith.constant 0 : i32
    return %c0_i32 : i32
  }
  func.func @transform_1(%arg0: i32) -> (i32, i32) {
    %c0_i32 = arith.constant 0 : i32
    %c0_i32_0 = arith.constant 0 : i32
    return %arg0, %c0_i32 : i32, i32
  }
  func.func @transform_2(%arg0: i32) -> (i32, i32) {
    %c0_i32 = arith.constant 0 : i32
    %c0_i32_0 = arith.constant 0 : i32
    return %arg0, %c0_i32 : i32, i32
  }
}

</mosaic_0001>

<bundles_post_ra>
// kernel: tpu_custom_call.1
= control target key start
LH: loop header
LB: loop body
LE: loop exit
PB: predicated region body
PF: predicated region fallthrough
CT: control target
= control target key end

     0   :  { %7 = vsyncpa [#allocation5], 0  ;;  %s195_s0 = inlined_call_operand.hbm [shape: f32[4], index: 0, kind: input, shape index: {}]   ;;  %s196_s1 = inlined_call_operand.hbm [shape: f32[4,512], index: 1, kind: input, shape index: {}]   ;;  %s197_s2 = inlined_call_operand.hbm [shape: f32[4,512], index: 2, kind: output, shape index: {}]  }
   0x1   :  { %8 = vsyncpa [#allocation3], 0 }
   0x2   :  { %9 = vsyncpa [#allocation4], 0  ;;  %s81_s11 = scalar_lea.hbm %s195_s0, 16 }
   0x3   :  { %p82_p0 = scmp.ne.s32.totalorder %s195_s0, %s81_s11  ;;  %p85_p1 = scmp.lt.u32.totalorder %s81_s11, %s195_s0 }
   0x5   :  { %p87_p2 = pnand %p85_p1, %p82_p0 }
   0x7   :  { %90 = shalt.err (!%p87_p2)
}
   0x8   :  { %s141_s16 = smov [#allocation2]   ;;  %s142_s19 = smov [#allocation6]  }
   0x9   :  { %17 = dma.hbm_to_smem %s195_s0, 16, %s141_s16, [#allocation5]  }
   0xa   :  { %s24_s20 = sshll.u32 %s142_s19, 4  ;;  %s91_s23 = scalar_lea.hbm %s196_s1, 256  ;;  %s25_s20 = int_to_ptr.vmem [resolvable:$true] %s24_s20 }
   0xb   :  { %p92_p3 = scmp.ne.s32.totalorder %s196_s1, %s91_s23  ;;  %p95_p4 = scmp.lt.u32.totalorder %s91_s23, %s196_s1 }
   0xd   :  { %p97_p5 = pnand %p95_p4, %p92_p3 }
   0xf   :  { %100 = shalt.err (!%p97_p5)
}
  0x10   :  { %s101_s28 = scalar_lea.vmem %s25_s20, 256  ;;  %p106_p7 = scmp.lt.s32.totalorder %s25_s20, %s25_s20 }
  0x11   :  { %p102_p6 = scmp.ne.s32.totalorder %s25_s20, %s101_s28  ;;  %p107_p8 = scmp.lt.s32.totalorder %s101_s28, %s101_s28 }
  0x13   :  { %p108_p9 = por %p107_p8, %p106_p7 }
  0x15   :  { %p109_p10 = pnand %p108_p9, %p102_p6 }
  0x17   :  { %112 = shalt.err (!%p109_p10)
}
  0x18   :  { %27 = dma.hbm_to_vmem [thread:$0]  %s196_s1, 256, %s25_s20, [#allocation3]  }
  0x19   :  { %135 = dma.done.wait [#allocation5], 16  }
  0x1a   :  { %136 = vsyncadd [#allocation5], 4294967280 }
  0x1b   :  { %137 = dma.done.wait [#allocation3], 256  }
  0x1c   :  { %138 = vsyncadd [#allocation3], 4294967040 }
  0x1d   :  { %34 = sfence }
  0x1e   :  { %s35_s30 = sld [smem:[#allocation2]]  ;;  %s75_s3 = sld [smem:[#allocation2 + $0x1]]  ;;  %v39_v0 = vld [vmem:[#allocation6] sm:$0xff]  ;;  %v40_v1 = vld [vmem:[#allocation6 + $0x8] sm:$0xff] }
  0x1f   :  { %s76_s4 = sld [smem:[#allocation2 + $0x2]]  ;;  %s77_s5 = sld [smem:[#allocation2 + $0x3]] }
  0x20   :  { %s143_s1 = smov [#allocation7]  }
  0x21   :  { %s65_s6 = sshll.u32 %s143_s1, 4  ;;  %s66_s6 = int_to_ptr.vmem [resolvable:$true] %s65_s6 }
  0x22   :  { %s113_s7 = scalar_lea.vmem %s66_s6, 256  ;;  %p118_p12 = scmp.lt.s32.totalorder %s66_s6, %s66_s6 }
  0x23   :  { %p114_p11 = scmp.ne.s32.totalorder %s66_s6, %s113_s7  ;;  %p119_p13 = scmp.lt.s32.totalorder %s113_s7, %s113_s7 }
  0x24   :  { %v41_v2 = vstv %s35_s30  ;;  %v44_v3 = vstv %s75_s3 }
  0x25   :  { %v42_v4 = vmul.f32 %v41_v2, %v39_v0  ;;  %v43_v5 = vmul.f32 %v41_v2, %v40_v1  ;;  %v49_v8 = vstv %s76_s4  ;;  %v54_v13 = vstv %s77_s5  ;;  %p120_p0 = por %p119_p13, %p118_p12 }
  0x27   :  { %v45_v6 = vadd.f32 %v44_v3, %v42_v4  ;;  %v46_v7 = vadd.f32 %v44_v3, %v43_v5  ;;  %p121_p1 = pnand %p120_p0, %p114_p11 }
  0x29   :  { %v47_v9 = vmul.f32 %v45_v6, %v39_v0  ;;  %v48_v10 = vmul.f32 %v46_v7, %v40_v1 }
  0x2b   :  { %v50_v11 = vadd.f32 %v49_v8, %v47_v9  ;;  %v51_v12 = vadd.f32 %v49_v8, %v48_v10 }
  0x2d   :  { %v52_v14 = vmul.f32 %v50_v11, %v39_v0  ;;  %v53_v15 = vmul.f32 %v51_v12, %v40_v1 }
  0x2f   :  { %v55_v16 = vadd.f32 %v54_v13, %v52_v14  ;;  %v56_v17 = vadd.f32 %v54_v13, %v53_v15 }
  0x31   :  { %57 = vst [vmem:[#allocation7] sm:$0xff] %v55_v16  ;;  %58 = vst [vmem:[#allocation7 + $0x8] sm:$0xff] %v56_v17 }
  0x32   :  { %124 = shalt.err (!%p121_p1)
}
  0x33   :  { %s125_s10 = scalar_lea.hbm %s197_s2, 256 }
  0x34   :  { %p126_p2 = scmp.ne.s32.totalorder %s197_s2, %s125_s10  ;;  %p129_p3 = scmp.lt.u32.totalorder %s125_s10, %s197_s2 }
  0x36   :  { %p131_p4 = pnand %p129_p3, %p126_p2 }
  0x38   :  { %134 = shalt.err (!%p131_p4)
}
  0x39   :  { %68 = dma.vmem_to_hbm [thread:$0]  %s66_s6, 256, %s197_s2, [#allocation4]  }
  0x3a   :  { %139 = dma.done.wait [#allocation4], 256  }
  0x3b   :  { %140 = vsyncadd [#allocation4], 4294967040 }
  0x3c   :  { %72 = vsyncpa [#allocation3], 1 }
  0x3d   :  { %73 = vsyncpa [#allocation4], 1 }
  0x3e   :  { %74 = vsyncpa [#allocation5], 1 }

</bundles_post_ra>
